<compile_context>
chip_gen: v6e
topology: v6e:2x2x1
jax: 0.10.0
libtpu: 0.0.40
codegen_flags: <defaults>
</compile_context>

<pallas_src>
import jax
import jax.numpy as jnp
from jax.experimental import pallas as pl
from jax.experimental.pallas import tpu as pltpu


def gru_encoder_seq_kernel(x_ref, h0_ref, wih_ref, whh_ref, bih_ref, bhh_ref,
                           out_ref):
    """Full T-step GRU encoder recurrence in a single kernel invocation.

    x_ref   : (T, H)   embedded input tokens
    h0_ref  : (1, H)   initial hidden state
    wih_ref : (H, 3H)  input-side weights, gate-concatenated [r | z | n]
    whh_ref : (H, 3H)  hidden-side weights, gate-concatenated [r | z | n]
    bih_ref : (1, 3H)  input-side bias
    bhh_ref : (1, 3H)  hidden-side bias
    out_ref : (T, H)   per-step GRU outputs (row t == hidden after step t)
    """
    T, H = x_ref.shape

    # Batched input-side path: one MXU matmul covering every timestep and all
    # three gates at once.
    gi = jnp.dot(x_ref[...], wih_ref[...],
                 preferred_element_type=jnp.float32) + bih_ref[...]      # (T, 3H)

    whh = whh_ref[...]
    bhh = bhh_ref[...]
    h = h0_ref[...]                                                      # (1, H)

    # True recurrence: only the hidden-side matmul is serial.  T is small and
    # static, so this Python loop is fully unrolled at trace time.
    for t in range(T):
        gh = jnp.dot(h, whh, preferred_element_type=jnp.float32) + bhh   # (1, 3H)
        gi_t = gi[t:t + 1, :]
        r = jax.nn.sigmoid(gi_t[:, 0:H] + gh[:, 0:H])
        z = jax.nn.sigmoid(gi_t[:, H:2 * H] + gh[:, H:2 * H])
        n = jnp.tanh(gi_t[:, 2 * H:3 * H] + r * gh[:, 2 * H:3 * H])
        h = (1.0 - z) * n + z * h
        out_ref[t:t + 1, :] = h


def encoder_forward(tokens, hidden, params):
    """Equivalent to looping Encoder.forward(token, hidden) over `tokens`.

    tokens: int32 scalar (original single-step forward) or (T,) token ids.
    hidden: (1, 1, H) initial hidden state (Encoder.initHidden()).
    Returns (output, hidden) with PyTorch GRU shapes:
      output (T, 1, H), hidden (1, 1, H).
    """
    tokens = jnp.atleast_1d(tokens).astype(jnp.int32)
    T = int(tokens.shape[0])
    H = params["embedding"].shape[1]

    # Embedding lookup for the whole sequence in one gather (glue, not kernel).
    x = params["embedding"][tokens].reshape(T, H).astype(jnp.float32)
    h0 = hidden.reshape(1, H).astype(jnp.float32)

    vmem = lambda: pl.BlockSpec(memory_space=pltpu.MemorySpace.VMEM)
    out = pl.pallas_call(
        gru_encoder_seq_kernel,
        out_shape=jax.ShapeDtypeStruct((T, H), jnp.float32),
        in_specs=[vmem() for _ in range(6)],
        out_specs=vmem(),
    )(x, h0, params["w_ih"], params["w_hh"], params["b_ih"], params["b_hh"])

    output = out.reshape(T, 1, H)
    h_final = out[T - 1].reshape(1, 1, H)   # final hidden == last output row
    return output, h_final


def encoder_forward_ref(tokens, hidden, params):
    """Pure-JAX reference implementing torch nn.GRU step semantics."""
    tokens = jnp.atleast_1d(tokens).astype(jnp.int32)
    T = int(tokens.shape[0])
    H = params["embedding"].shape[1]
    x = params["embedding"][tokens].reshape(T, H)
    h = hidden.reshape(1, H)
    outs = []
    for t in range(T):
        gi = x[t:t + 1] @ params["w_ih"] + params["b_ih"]
        gh = h @ params["w_hh"] + params["b_hh"]
        r = jax.nn.sigmoid(gi[:, 0:H] + gh[:, 0:H])
        z = jax.nn.sigmoid(gi[:, H:2 * H] + gh[:, H:2 * H])
        n = jnp.tanh(gi[:, 2 * H:3 * H] + r * gh[:, 2 * H:3 * H])
        h = (1.0 - z) * n + z * h
        outs.append(h)
    return jnp.stack(outs).reshape(T, 1, H), h.reshape(1, 1, H)


if __name__ == "__main__":
    input_size, hidden_size, seq_len = 10, 32, 8   # vocab, H, T

    key = jax.random.PRNGKey(0)
    k1, k2, k3, k4, k5, k6 = jax.random.split(key, 6)
    bound = 1.0 / float(jnp.sqrt(hidden_size))
    params = {
        # nn.Embedding(input_size, hidden_size): N(0, 1) init
        "embedding": jax.random.normal(k1, (input_size, hidden_size), jnp.float32),
        # nn.GRU(hidden, hidden) weights, pre-transposed + gate-concatenated
        # along columns in PyTorch gate order [r | z | n]  ->  (H, 3H)
        "w_ih": jax.random.uniform(k2, (hidden_size, 3 * hidden_size),
                                   jnp.float32, -bound, bound),
        "w_hh": jax.random.uniform(k3, (hidden_size, 3 * hidden_size),
                                   jnp.float32, -bound, bound),
        "b_ih": jax.random.uniform(k4, (1, 3 * hidden_size),
                                   jnp.float32, -bound, bound),
        "b_hh": jax.random.uniform(k5, (1, 3 * hidden_size),
                                   jnp.float32, -bound, bound),
    }

    tokens = jax.random.randint(k6, (seq_len,), 0, input_size, jnp.int32)
    hidden0 = jnp.zeros((1, 1, hidden_size), jnp.float32)   # Encoder.initHidden()

    # Full-sequence encode (one kernel launch for all T steps).
    out, h_final = encoder_forward(tokens, hidden0, params)
    jax.block_until_ready((out, h_final))

    out_ref, h_ref = encoder_forward_ref(tokens, hidden0, params)
    assert out.shape == (seq_len, 1, hidden_size)
    assert h_final.shape == (1, 1, hidden_size)
    assert jnp.allclose(out, out_ref, atol=1e-5, rtol=1e-5)
    assert jnp.allclose(h_final, h_ref, atol=1e-5, rtol=1e-5)

    # Single-token call, mirroring the original Encoder.forward signature.
    out1, h1 = encoder_forward(jnp.array(3, jnp.int32), hidden0, params)
    jax.block_until_ready((out1, h1))
    out1_ref, h1_ref = encoder_forward_ref(jnp.array(3, jnp.int32), hidden0, params)
    assert out1.shape == (1, 1, hidden_size) and h1.shape == (1, 1, hidden_size)
    assert jnp.allclose(out1, out1_ref, atol=1e-5, rtol=1e-5)
    assert jnp.allclose(h1, h1_ref, atol=1e-5, rtol=1e-5)

    print("KERNEL_OK")
</pallas_src>

<mosaic_0001>
module attributes {stable_mosaic.version = 11 : i64} {
  func.func @gru_encoder_seq_kernel(%arg0: memref<8x32xf32, #tpu.memory_space<vmem>>, %arg1: memref<1x32xf32, #tpu.memory_space<vmem>>, %arg2: memref<32x96xf32, #tpu.memory_space<vmem>>, %arg3: memref<32x96xf32, #tpu.memory_space<vmem>>, %arg4: memref<1x96xf32, #tpu.memory_space<vmem>>, %arg5: memref<1x96xf32, #tpu.memory_space<vmem>>, %arg6: memref<8x32xf32, #tpu.memory_space<vmem>>) attributes {dimension_semantics = [], scalar_prefetch = 0 : i64, scratch_operands = 0 : i64, tpu.core_type = #tpu.core_type<tc>} {
    %c0 = arith.constant 0 : index
    %c0_0 = arith.constant 0 : index
    %0 = vector.load %arg0[%c0, %c0_0] : memref<8x32xf32, #tpu.memory_space<vmem>>, vector<8x32xf32>
    %c0_1 = arith.constant 0 : index
    %c0_2 = arith.constant 0 : index
    %1 = vector.load %arg2[%c0_1, %c0_2] : memref<32x96xf32, #tpu.memory_space<vmem>>, vector<32x96xf32>
    %cst = arith.constant dense<0.000000e+00> : vector<8x96xf32>
    %2 = tpu.matmul %0, %1, %cst {dimension_numbers = #tpu.dot_dimension_numbers<[1], [0], [0], [1], [0, 0, 1, 1], [], []>} : vector<8x32xf32>, vector<32x96xf32>, vector<8x96xf32> -> vector<8x96xf32>
    %c0_3 = arith.constant 0 : index
    %c0_4 = arith.constant 0 : index
    %3 = vector.load %arg4[%c0_3, %c0_4] : memref<1x96xf32, #tpu.memory_space<vmem>>, vector<1x96xf32>
    %4 = vector.broadcast %3 : vector<1x96xf32> to vector<8x96xf32>
    %5 = arith.addf %2, %4 : vector<8x96xf32>
    %c0_5 = arith.constant 0 : index
    %c0_6 = arith.constant 0 : index
    %6 = vector.load %arg3[%c0_5, %c0_6] : memref<32x96xf32, #tpu.memory_space<vmem>>, vector<32x96xf32>
    %c0_7 = arith.constant 0 : index
    %c0_8 = arith.constant 0 : index
    %7 = vector.load %arg5[%c0_7, %c0_8] : memref<1x96xf32, #tpu.memory_space<vmem>>, vector<1x96xf32>
    %c0_9 = arith.constant 0 : index
    %c0_10 = arith.constant 0 : index
    %8 = vector.load %arg1[%c0_9, %c0_10] : memref<1x32xf32, #tpu.memory_space<vmem>>, vector<1x32xf32>
    %cst_11 = arith.constant dense<0.000000e+00> : vector<1x96xf32>
    %9 = tpu.matmul %8, %6, %cst_11 {dimension_numbers = #tpu.dot_dimension_numbers<[1], [0], [0], [1], [0, 0, 1, 1], [], []>} : vector<1x32xf32>, vector<32x96xf32>, vector<1x96xf32> -> vector<1x96xf32>
    %10 = arith.addf %9, %7 : vector<1x96xf32>
    %11 = vector.extract_strided_slice %5 {offsets = [0, 0], sizes = [1, 96], strides = [1, 1]} : vector<8x96xf32> to vector<1x96xf32>
    %12 = vector.extract_strided_slice %11 {offsets = [0, 0], sizes = [1, 32], strides = [1, 1]} : vector<1x96xf32> to vector<1x32xf32>
    %13 = vector.extract_strided_slice %10 {offsets = [0, 0], sizes = [1, 32], strides = [1, 1]} : vector<1x96xf32> to vector<1x32xf32>
    %14 = arith.addf %12, %13 : vector<1x32xf32>
    %15 = arith.negf %14 : vector<1x32xf32>
    %16 = math.exp %15 : vector<1x32xf32>
    %cst_12 = arith.constant 1.000000e+00 : f32
    %17 = vector.broadcast %cst_12 : f32 to vector<1x32xf32>
    %18 = arith.addf %17, %16 : vector<1x32xf32>
    %19 = arith.divf %17, %18 : vector<1x32xf32>
    %20 = vector.extract_strided_slice %11 {offsets = [0, 32], sizes = [1, 32], strides = [1, 1]} : vector<1x96xf32> to vector<1x32xf32>
    %21 = vector.extract_strided_slice %10 {offsets = [0, 32], sizes = [1, 32], strides = [1, 1]} : vector<1x96xf32> to vector<1x32xf32>
    %22 = arith.addf %20, %21 : vector<1x32xf32>
    %23 = arith.negf %22 : vector<1x32xf32>
    %24 = math.exp %23 : vector<1x32xf32>
    %cst_13 = arith.constant 1.000000e+00 : f32
    %25 = vector.broadcast %cst_13 : f32 to vector<1x32xf32>
    %26 = arith.addf %25, %24 : vector<1x32xf32>
    %27 = arith.divf %25, %26 : vector<1x32xf32>
    %28 = vector.extract_strided_slice %11 {offsets = [0, 64], sizes = [1, 32], strides = [1, 1]} : vector<1x96xf32> to vector<1x32xf32>
    %29 = vector.extract_strided_slice %10 {offsets = [0, 64], sizes = [1, 32], strides = [1, 1]} : vector<1x96xf32> to vector<1x32xf32>
    %30 = arith.mulf %19, %29 : vector<1x32xf32>
    %31 = arith.addf %28, %30 : vector<1x32xf32>
    %32 = math.tanh %31 : vector<1x32xf32>
    %cst_14 = arith.constant 1.000000e+00 : f32
    %33 = vector.broadcast %cst_14 : f32 to vector<1x32xf32>
    %34 = arith.subf %33, %27 : vector<1x32xf32>
    %35 = arith.mulf %34, %32 : vector<1x32xf32>
    %36 = arith.mulf %27, %8 : vector<1x32xf32>
    %37 = arith.addf %35, %36 : vector<1x32xf32>
    %c0_15 = arith.constant 0 : index
    %c0_16 = arith.constant 0 : index
    %38 = vector.load %arg6[%c0_15, %c0_16] : memref<8x32xf32, #tpu.memory_space<vmem>>, vector<1x32xf32>
    tpu.vector_store %arg6[%c0_15, %c0_16], %37 {strides = array<i32>} : memref<8x32xf32, #tpu.memory_space<vmem>>, vector<1x32xf32>,
    %cst_17 = arith.constant dense<0.000000e+00> : vector<1x96xf32>
    %39 = tpu.matmul %37, %6, %cst_17 {dimension_numbers = #tpu.dot_dimension_numbers<[1], [0], [0], [1], [0, 0, 1, 1], [], []>} : vector<1x32xf32>, vector<32x96xf32>, vector<1x96xf32> -> vector<1x96xf32>
    %40 = arith.addf %39, %7 : vector<1x96xf32>
    %41 = vector.extract_strided_slice %5 {offsets = [1, 0], sizes = [1, 96], strides = [1, 1]} : vector<8x96xf32> to vector<1x96xf32>
    %42 = vector.extract_strided_slice %41 {offsets = [0, 0], sizes = [1, 32], strides = [1, 1]} : vector<1x96xf32> to vector<1x32xf32>
    %43 = vector.extract_strided_slice %40 {offsets = [0, 0], sizes = [1, 32], strides = [1, 1]} : vector<1x96xf32> to vector<1x32xf32>
    %44 = arith.addf %42, %43 : vector<1x32xf32>
    %45 = arith.negf %44 : vector<1x32xf32>
    %46 = math.exp %45 : vector<1x32xf32>
    %cst_18 = arith.constant 1.000000e+00 : f32
    %47 = vector.broadcast %cst_18 : f32 to vector<1x32xf32>
    %48 = arith.addf %47, %46 : vector<1x32xf32>
    %49 = arith.divf %47, %48 : vector<1x32xf32>
    %50 = vector.extract_strided_slice %41 {offsets = [0, 32], sizes = [1, 32], strides = [1, 1]} : vector<1x96xf32> to vector<1x32xf32>
    %51 = vector.extract_strided_slice %40 {offsets = [0, 32], sizes = [1, 32], strides = [1, 1]} : vector<1x96xf32> to vector<1x32xf32>
    %52 = arith.addf %50, %51 : vector<1x32xf32>
    %53 = arith.negf %52 : vector<1x32xf32>
    %54 = math.exp %53 : vector<1x32xf32>
    %cst_19 = arith.constant 1.000000e+00 : f32
    %55 = vector.broadcast %cst_19 : f32 to vector<1x32xf32>
    %56 = arith.addf %55, %54 : vector<1x32xf32>
    %57 = arith.divf %55, %56 : vector<1x32xf32>
    %58 = vector.extract_strided_slice %41 {offsets = [0, 64], sizes = [1, 32], strides = [1, 1]} : vector<1x96xf32> to vector<1x32xf32>
    %59 = vector.extract_strided_slice %40 {offsets = [0, 64], sizes = [1, 32], strides = [1, 1]} : vector<1x96xf32> to vector<1x32xf32>
    %60 = arith.mulf %49, %59 : vector<1x32xf32>
    %61 = arith.addf %58, %60 : vector<1x32xf32>
    %62 = math.tanh %61 : vector<1x32xf32>
    %cst_20 = arith.constant 1.000000e+00 : f32
    %63 = vector.broadcast %cst_20 : f32 to vector<1x32xf32>
    %64 = arith.subf %63, %57 : vector<1x32xf32>
    %65 = arith.mulf %64, %62 : vector<1x32xf32>
    %66 = arith.mulf %57, %37 : vector<1x32xf32>
    %67 = arith.addf %65, %66 : vector<1x32xf32>
    %c1 = arith.constant 1 : index
    %c0_21 = arith.constant 0 : index
    %68 = vector.load %arg6[%c1, %c0_21] : memref<8x32xf32, #tpu.memory_space<vmem>>, vector<1x32xf32>
    tpu.vector_store %arg6[%c1, %c0_21], %67 {strides = array<i32>} : memref<8x32xf32, #tpu.memory_space<vmem>>, vector<1x32xf32>,
    %cst_22 = arith.constant dense<0.000000e+00> : vector<1x96xf32>
    %69 = tpu.matmul %67, %6, %cst_22 {dimension_numbers = #tpu.dot_dimension_numbers<[1], [0], [0], [1], [0, 0, 1, 1], [], []>} : vector<1x32xf32>, vector<32x96xf32>, vector<1x96xf32> -> vector<1x96xf32>
    %70 = arith.addf %69, %7 : vector<1x96xf32>
    %71 = vector.extract_strided_slice %5 {offsets = [2, 0], sizes = [1, 96], strides = [1, 1]} : vector<8x96xf32> to vector<1x96xf32>
    %72 = vector.extract_strided_slice %71 {offsets = [0, 0], sizes = [1, 32], strides = [1, 1]} : vector<1x96xf32> to vector<1x32xf32>
    %73 = vector.extract_strided_slice %70 {offsets = [0, 0], sizes = [1, 32], strides = [1, 1]} : vector<1x96xf32> to vector<1x32xf32>
    %74 = arith.addf %72, %73 : vector<1x32xf32>
    %75 = arith.negf %74 : vector<1x32xf32>
    %76 = math.exp %75 : vector<1x32xf32>
    %cst_23 = arith.constant 1.000000e+00 : f32
    %77 = vector.broadcast %cst_23 : f32 to vector<1x32xf32>
    %78 = arith.addf %77, %76 : vector<1x32xf32>
    %79 = arith.divf %77, %78 : vector<1x32xf32>
    %80 = vector.extract_strided_slice %71 {offsets = [0, 32], sizes = [1, 32], strides = [1, 1]} : vector<1x96xf32> to vector<1x32xf32>
    %81 = vector.extract_strided_slice %70 {offsets = [0, 32], sizes = [1, 32], strides = [1, 1]} : vector<1x96xf32> to vector<1x32xf32>
    %82 = arith.addf %80, %81 : vector<1x32xf32>
    %83 = arith.negf %82 : vector<1x32xf32>
    %84 = math.exp %83 : vector<1x32xf32>
    %cst_24 = arith.constant 1.000000e+00 : f32
    %85 = vector.broadcast %cst_24 : f32 to vector<1x32xf32>
    %86 = arith.addf %85, %84 : vector<1x32xf32>
    %87 = arith.divf %85, %86 : vector<1x32xf32>
    %88 = vector.extract_strided_slice %71 {offsets = [0, 64], sizes = [1, 32], strides = [1, 1]} : vector<1x96xf32> to vector<1x32xf32>
    %89 = vector.extract_strided_slice %70 {offsets = [0, 64], sizes = [1, 32], strides = [1, 1]} : vector<1x96xf32> to vector<1x32xf32>
    %90 = arith.mulf %79, %89 : vector<1x32xf32>
    %91 = arith.addf %88, %90 : vector<1x32xf32>
    %92 = math.tanh %91 : vector<1x32xf32>
    %cst_25 = arith.constant 1.000000e+00 : f32
    %93 = vector.broadcast %cst_25 : f32 to vector<1x32xf32>
    %94 = arith.subf %93, %87 : vector<1x32xf32>
    %95 = arith.mulf %94, %92 : vector<1x32xf32>
    %96 = arith.mulf %87, %67 : vector<1x32xf32>
    %97 = arith.addf %95, %96 : vector<1x32xf32>
    %c2 = arith.constant 2 : index
    %c0_26 = arith.constant 0 : index
    %98 = vector.load %arg6[%c2, %c0_26] : memref<8x32xf32, #tpu.memory_space<vmem>>, vector<1x32xf32>
    tpu.vector_store %arg6[%c2, %c0_26], %97 {strides = array<i32>} : memref<8x32xf32, #tpu.memory_space<vmem>>, vector<1x32xf32>,
    %cst_27 = arith.constant dense<0.000000e+00> : vector<1x96xf32>
    %99 = tpu.matmul %97, %6, %cst_27 {dimension_numbers = #tpu.dot_dimension_numbers<[1], [0], [0], [1], [0, 0, 1, 1], [], []>} : vector<1x32xf32>, vector<32x96xf32>, vector<1x96xf32> -> vector<1x96xf32>
    %100 = arith.addf %99, %7 : vector<1x96xf32>
    %101 = vector.extract_strided_slice %5 {offsets = [3, 0], sizes = [1, 96], strides = [1, 1]} : vector<8x96xf32> to vector<1x96xf32>
    %102 = vector.extract_strided_slice %101 {offsets = [0, 0], sizes = [1, 32], strides = [1, 1]} : vector<1x96xf32> to vector<1x32xf32>
    %103 = vector.extract_strided_slice %100 {offsets = [0, 0], sizes = [1, 32], strides = [1, 1]} : vector<1x96xf32> to vector<1x32xf32>
    %104 = arith.addf %102, %103 : vector<1x32xf32>
    %105 = arith.negf %104 : vector<1x32xf32>
    %106 = math.exp %105 : vector<1x32xf32>
    %cst_28 = arith.constant 1.000000e+00 : f32
    %107 = vector.broadcast %cst_28 : f32 to vector<1x32xf32>
    %108 = arith.addf %107, %106 : vector<1x32xf32>
    %109 = arith.divf %107, %108 : vector<1x32xf32>
    %110 = vector.extract_strided_slice %101 {offsets = [0, 32], sizes = [1, 32], strides = [1, 1]} : vector<1x96xf32> to vector<1x32xf32>
    %111 = vector.extract_strided_slice %100 {offsets = [0, 32], sizes = [1, 32], strides = [1, 1]} : vector<1x96xf32> to vector<1x32xf32>
    %112 = arith.addf %110, %111 : vector<1x32xf32>
    %113 = arith.negf %112 : vector<1x32xf32>
    %114 = math.exp %113 : vector<1x32xf32>
    %cst_29 = arith.constant 1.000000e+00 : f32
    %115 = vector.broadcast %cst_29 : f32 to vector<1x32xf32>
    %116 = arith.addf %115, %114 : vector<1x32xf32>
    %117 = arith.divf %115, %116 : vector<1x32xf32>
    %118 = vector.extract_strided_slice %101 {offsets = [0, 64], sizes = [1, 32], strides = [1, 1]} : vector<1x96xf32> to vector<1x32xf32>
    %119 = vector.extract_strided_slice %100 {offsets = [0, 64], sizes = [1, 32], strides = [1, 1]} : vector<1x96xf32> to vector<1x32xf32>
    %120 = arith.mulf %109, %119 : vector<1x32xf32>
    %121 = arith.addf %118, %120 : vector<1x32xf32>
    %122 = math.tanh %121 : vector<1x32xf32>
    %cst_30 = arith.constant 1.000000e+00 : f32
    %123 = vector.broadcast %cst_30 : f32 to vector<1x32xf32>
    %124 = arith.subf %123, %117 : vector<1x32xf32>
    %125 = arith.mulf %124, %122 : vector<1x32xf32>
    %126 = arith.mulf %117, %97 : vector<1x32xf32>
    %127 = arith.addf %125, %126 : vector<1x32xf32>
    %c3 = arith.constant 3 : index
    %c0_31 = arith.constant 0 : index
    %128 = vector.load %arg6[%c3, %c0_31] : memref<8x32xf32, #tpu.memory_space<vmem>>, vector<1x32xf32>
    tpu.vector_store %arg6[%c3, %c0_31], %127 {strides = array<i32>} : memref<8x32xf32, #tpu.memory_space<vmem>>, vector<1x32xf32>,
    %cst_32 = arith.constant dense<0.000000e+00> : vector<1x96xf32>
    %129 = tpu.matmul %127, %6, %cst_32 {dimension_numbers = #tpu.dot_dimension_numbers<[1], [0], [0], [1], [0, 0, 1, 1], [], []>} : vector<1x32xf32>, vector<32x96xf32>, vector<1x96xf32> -> vector<1x96xf32>
    %130 = arith.addf %129, %7 : vector<1x96xf32>
    %131 = vector.extract_strided_slice %5 {offsets = [4, 0], sizes = [1, 96], strides = [1, 1]} : vector<8x96xf32> to vector<1x96xf32>
    %132 = vector.extract_strided_slice %131 {offsets = [0, 0], sizes = [1, 32], strides = [1, 1]} : vector<1x96xf32> to vector<1x32xf32>
    %133 = vector.extract_strided_slice %130 {offsets = [0, 0], sizes = [1, 32], strides = [1, 1]} : vector<1x96xf32> to vector<1x32xf32>
    %134 = arith.addf %132, %133 : vector<1x32xf32>
    %135 = arith.negf %134 : vector<1x32xf32>
    %136 = math.exp %135 : vector<1x32xf32>
    %cst_33 = arith.constant 1.000000e+00 : f32
    %137 = vector.broadcast %cst_33 : f32 to vector<1x32xf32>
    %138 = arith.addf %137, %136 : vector<1x32xf32>
    %139 = arith.divf %137, %138 : vector<1x32xf32>
    %140 = vector.extract_strided_slice %131 {offsets = [0, 32], sizes = [1, 32], strides = [1, 1]} : vector<1x96xf32> to vector<1x32xf32>
    %141 = vector.extract_strided_slice %130 {offsets = [0, 32], sizes = [1, 32], strides = [1, 1]} : vector<1x96xf32> to vector<1x32xf32>
    %142 = arith.addf %140, %141 : vector<1x32xf32>
    %143 = arith.negf %142 : vector<1x32xf32>
    %144 = math.exp %143 : vector<1x32xf32>
    %cst_34 = arith.constant 1.000000e+00 : f32
    %145 = vector.broadcast %cst_34 : f32 to vector<1x32xf32>
    %146 = arith.addf %145, %144 : vector<1x32xf32>
    %147 = arith.divf %145, %146 : vector<1x32xf32>
    %148 = vector.extract_strided_slice %131 {offsets = [0, 64], sizes = [1, 32], strides = [1, 1]} : vector<1x96xf32> to vector<1x32xf32>
    %149 = vector.extract_strided_slice %130 {offsets = [0, 64], sizes = [1, 32], strides = [1, 1]} : vector<1x96xf32> to vector<1x32xf32>
    %150 = arith.mulf %139, %149 : vector<1x32xf32>
    %151 = arith.addf %148, %150 : vector<1x32xf32>
    %152 = math.tanh %151 : vector<1x32xf32>
    %cst_35 = arith.constant 1.000000e+00 : f32
    %153 = vector.broadcast %cst_35 : f32 to vector<1x32xf32>
    %154 = arith.subf %153, %147 : vector<1x32xf32>
    %155 = arith.mulf %154, %152 : vector<1x32xf32>
    %156 = arith.mulf %147, %127 : vector<1x32xf32>
    %157 = arith.addf %155, %156 : vector<1x32xf32>
    %c4 = arith.constant 4 : index
    %c0_36 = arith.constant 0 : index
    %158 = vector.load %arg6[%c4, %c0_36] : memref<8x32xf32, #tpu.memory_space<vmem>>, vector<1x32xf32>
    tpu.vector_store %arg6[%c4, %c0_36], %157 {strides = array<i32>} : memref<8x32xf32, #tpu.memory_space<vmem>>, vector<1x32xf32>,
    %cst_37 = arith.constant dense<0.000000e+00> : vector<1x96xf32>
    %159 = tpu.matmul %157, %6, %cst_37 {dimension_numbers = #tpu.dot_dimension_numbers<[1], [0], [0], [1], [0, 0, 1, 1], [], []>} : vector<1x32xf32>, vector<32x96xf32>, vector<1x96xf32> -> vector<1x96xf32>
    %160 = arith.addf %159, %7 : vector<1x96xf32>
    %161 = vector.extract_strided_slice %5 {offsets = [5, 0], sizes = [1, 96], strides = [1, 1]} : vector<8x96xf32> to vector<1x96xf32>
    %162 = vector.extract_strided_slice %161 {offsets = [0, 0], sizes = [1, 32], strides = [1, 1]} : vector<1x96xf32> to vector<1x32xf32>
    %163 = vector.extract_strided_slice %160 {offsets = [0, 0], sizes = [1, 32], strides = [1, 1]} : vector<1x96xf32> to vector<1x32xf32>
    %164 = arith.addf %162, %163 : vector<1x32xf32>
    %165 = arith.negf %164 : vector<1x32xf32>
    %166 = math.exp %165 : vector<1x32xf32>
    %cst_38 = arith.constant 1.000000e+00 : f32
    %167 = vector.broadcast %cst_38 : f32 to vector<1x32xf32>
    %168 = arith.addf %167, %166 : vector<1x32xf32>
    %169 = arith.divf %167, %168 : vector<1x32xf32>
    %170 = vector.extract_strided_slice %161 {offsets = [0, 32], sizes = [1, 32], strides = [1, 1]} : vector<1x96xf32> to vector<1x32xf32>
    %171 = vector.extract_strided_slice %160 {offsets = [0, 32], sizes = [1, 32], strides = [1, 1]} : vector<1x96xf32> to vector<1x32xf32>
    %172 = arith.addf %170, %171 : vector<1x32xf32>
    %173 = arith.negf %172 : vector<1x32xf32>
    %174 = math.exp %173 : vector<1x32xf32>
    %cst_39 = arith.constant 1.000000e+00 : f32
    %175 = vector.broadcast %cst_39 : f32 to vector<1x32xf32>
    %176 = arith.addf %175, %174 : vector<1x32xf32>
    %177 = arith.divf %175, %176 : vector<1x32xf32>
    %178 = vector.extract_strided_slice %161 {offsets = [0, 64], sizes = [1, 32], strides = [1, 1]} : vector<1x96xf32> to vector<1x32xf32>
    %179 = vector.extract_strided_slice %160 {offsets = [0, 64], sizes = [1, 32], strides = [1, 1]} : vector<1x96xf32> to vector<1x32xf32>
    %180 = arith.mulf %169, %179 : vector<1x32xf32>
    %181 = arith.addf %178, %180 : vector<1x32xf32>
    %182 = math.tanh %181 : vector<1x32xf32>
    %cst_40 = arith.constant 1.000000e+00 : f32
    %183 = vector.broadcast %cst_40 : f32 to vector<1x32xf32>
    %184 = arith.subf %183, %177 : vector<1x32xf32>
    %185 = arith.mulf %184, %182 : vector<1x32xf32>
    %186 = arith.mulf %177, %157 : vector<1x32xf32>
    %187 = arith.addf %185, %186 : vector<1x32xf32>
    %c5 = arith.constant 5 : index
    %c0_41 = arith.constant 0 : index
    %188 = vector.load %arg6[%c5, %c0_41] : memref<8x32xf32, #tpu.memory_space<vmem>>, vector<1x32xf32>
    tpu.vector_store %arg6[%c5, %c0_41], %187 {strides = array<i32>} : memref<8x32xf32, #tpu.memory_space<vmem>>, vector<1x32xf32>,
    %cst_42 = arith.constant dense<0.000000e+00> : vector<1x96xf32>
    %189 = tpu.matmul %187, %6, %cst_42 {dimension_numbers = #tpu.dot_dimension_numbers<[1], [0], [0], [1], [0, 0, 1, 1], [], []>} : vector<1x32xf32>, vector<32x96xf32>, vector<1x96xf32> -> vector<1x96xf32>
    %190 = arith.addf %189, %7 : vector<1x96xf32>
    %191 = vector.extract_strided_slice %5 {offsets = [6, 0], sizes = [1, 96], strides = [1, 1]} : vector<8x96xf32> to vector<1x96xf32>
    %192 = vector.extract_strided_slice %191 {offsets = [0, 0], sizes = [1, 32], strides = [1, 1]} : vector<1x96xf32> to vector<1x32xf32>
    %193 = vector.extract_strided_slice %190 {offsets = [0, 0], sizes = [1, 32], strides = [1, 1]} : vector<1x96xf32> to vector<1x32xf32>
    %194 = arith.addf %192, %193 : vector<1x32xf32>
    %195 = arith.negf %194 : vector<1x32xf32>
    %196 = math.exp %195 : vector<1x32xf32>
    %cst_43 = arith.constant 1.000000e+00 : f32
    %197 = vector.broadcast %cst_43 : f32 to vector<1x32xf32>
    %198 = arith.addf %197, %196 : vector<1x32xf32>
    %199 = arith.divf %197, %198 : vector<1x32xf32>
    %200 = vector.extract_strided_slice %191 {offsets = [0, 32], sizes = [1, 32], strides = [1, 1]} : vector<1x96xf32> to vector<1x32xf32>
    %201 = vector.extract_strided_slice %190 {offsets = [0, 32], sizes = [1, 32], strides = [1, 1]} : vector<1x96xf32> to vector<1x32xf32>
    %202 = arith.addf %200, %201 : vector<1x32xf32>
    %203 = arith.negf %202 : vector<1x32xf32>
    %204 = math.exp %203 : vector<1x32xf32>
    %cst_44 = arith.constant 1.000000e+00 : f32
    %205 = vector.broadcast %cst_44 : f32 to vector<1x32xf32>
    %206 = arith.addf %205, %204 : vector<1x32xf32>
    %207 = arith.divf %205, %206 : vector<1x32xf32>
    %208 = vector.extract_strided_slice %191 {offsets = [0, 64], sizes = [1, 32], strides = [1, 1]} : vector<1x96xf32> to vector<1x32xf32>
    %209 = vector.extract_strided_slice %190 {offsets = [0, 64], sizes = [1, 32], strides = [1, 1]} : vector<1x96xf32> to vector<1x32xf32>
    %210 = arith.mulf %199, %209 : vector<1x32xf32>
    %211 = arith.addf %208, %210 : vector<1x32xf32>
    %212 = math.tanh %211 : vector<1x32xf32>
    %cst_45 = arith.constant 1.000000e+00 : f32
    %213 = vector.broadcast %cst_45 : f32 to vector<1x32xf32>
    %214 = arith.subf %213, %207 : vector<1x32xf32>
    %215 = arith.mulf %214, %212 : vector<1x32xf32>
    %216 = arith.mulf %207, %187 : vector<1x32xf32>
    %217 = arith.addf %215, %216 : vector<1x32xf32>
    %c6 = arith.constant 6 : index
    %c0_46 = arith.constant 0 : index
    %218 = vector.load %arg6[%c6, %c0_46] : memref<8x32xf32, #tpu.memory_space<vmem>>, vector<1x32xf32>
    tpu.vector_store %arg6[%c6, %c0_46], %217 {strides = array<i32>} : memref<8x32xf32, #tpu.memory_space<vmem>>, vector<1x32xf32>,
    %cst_47 = arith.constant dense<0.000000e+00> : vector<1x96xf32>
    %219 = tpu.matmul %217, %6, %cst_47 {dimension_numbers = #tpu.dot_dimension_numbers<[1], [0], [0], [1], [0, 0, 1, 1], [], []>} : vector<1x32xf32>, vector<32x96xf32>, vector<1x96xf32> -> vector<1x96xf32>
    %220 = arith.addf %219, %7 : vector<1x96xf32>
    %221 = vector.extract_strided_slice %5 {offsets = [7, 0], sizes = [1, 96], strides = [1, 1]} : vector<8x96xf32> to vector<1x96xf32>
    %222 = vector.extract_strided_slice %221 {offsets = [0, 0], sizes = [1, 32], strides = [1, 1]} : vector<1x96xf32> to vector<1x32xf32>
    %223 = vector.extract_strided_slice %220 {offsets = [0, 0], sizes = [1, 32], strides = [1, 1]} : vector<1x96xf32> to vector<1x32xf32>
    %224 = arith.addf %222, %223 : vector<1x32xf32>
    %225 = arith.negf %224 : vector<1x32xf32>
    %226 = math.exp %225 : vector<1x32xf32>
    %cst_48 = arith.constant 1.000000e+00 : f32
    %227 = vector.broadcast %cst_48 : f32 to vector<1x32xf32>
    %228 = arith.addf %227, %226 : vector<1x32xf32>
    %229 = arith.divf %227, %228 : vector<1x32xf32>
    %230 = vector.extract_strided_slice %221 {offsets = [0, 32], sizes = [1, 32], strides = [1, 1]} : vector<1x96xf32> to vector<1x32xf32>
    %231 = vector.extract_strided_slice %220 {offsets = [0, 32], sizes = [1, 32], strides = [1, 1]} : vector<1x96xf32> to vector<1x32xf32>
    %232 = arith.addf %230, %231 : vector<1x32xf32>
    %233 = arith.negf %232 : vector<1x32xf32>
    %234 = math.exp %233 : vector<1x32xf32>
    %cst_49 = arith.constant 1.000000e+00 : f32
    %235 = vector.broadcast %cst_49 : f32 to vector<1x32xf32>
    %236 = arith.addf %235, %234 : vector<1x32xf32>
    %237 = arith.divf %235, %236 : vector<1x32xf32>
    %238 = vector.extract_strided_slice %221 {offsets = [0, 64], sizes = [1, 32], strides = [1, 1]} : vector<1x96xf32> to vector<1x32xf32>
    %239 = vector.extract_strided_slice %220 {offsets = [0, 64], sizes = [1, 32], strides = [1, 1]} : vector<1x96xf32> to vector<1x32xf32>
    %240 = arith.mulf %229, %239 : vector<1x32xf32>
    %241 = arith.addf %238, %240 : vector<1x32xf32>
    %242 = math.tanh %241 : vector<1x32xf32>
    %cst_50 = arith.constant 1.000000e+00 : f32
    %243 = vector.broadcast %cst_50 : f32 to vector<1x32xf32>
    %244 = arith.subf %243, %237 : vector<1x32xf32>
    %245 = arith.mulf %244, %242 : vector<1x32xf32>
    %246 = arith.mulf %237, %217 : vector<1x32xf32>
    %247 = arith.addf %245, %246 : vector<1x32xf32>
    %c7 = arith.constant 7 : index
    %c0_51 = arith.constant 0 : index
    %248 = vector.load %arg6[%c7, %c0_51] : memref<8x32xf32, #tpu.memory_space<vmem>>, vector<1x32xf32>
    tpu.vector_store %arg6[%c7, %c0_51], %247 {strides = array<i32>} : memref<8x32xf32, #tpu.memory_space<vmem>>, vector<1x32xf32>,
    return
  }
}

</mosaic_0001>

<bundles_post_ra>
// kernel: tpu_custom_call.1
= control target key start
LH: loop header
LB: loop body
LE: loop exit
PB: predicated region body
PF: predicated region fallthrough
CT: control target
= control target key end

     0   :  { %11 = vsyncpa [#allocation3], 0  ;;  %s1620_s0 = inlined_call_operand.hbm [shape: f32[8,32], index: 0, kind: input, shape index: {}]   ;;  %s1621_s1 = inlined_call_operand.vmem [shape: f32[1,32], index: 1, kind: input, shape index: {}]   ;;  %s1622_s2 = inlined_call_operand.hbm [shape: f32[32,96], index: 2, kind: input, shape index: {}]   ;;  %s1623_s3 = inlined_call_operand.hbm [shape: f32[32,96], index: 3, kind: input, shape index: {}]   ;;  %s1624_s4 = inlined_call_operand.vmem [shape: f32[1,96], index: 4, kind: input, shape index: {}]   ;;  %s1625_s5 = inlined_call_operand.vmem [shape: f32[1,96], index: 5, kind: input, shape index: {}]   ;;  %s1626_s6 = inlined_call_operand.hbm [shape: f32[8,32], index: 6, kind: output, shape index: {}]  }
   0x1   :  { %12 = vsyncpa [#allocation6], 0 }
   0x2   :  { %13 = vsyncpa [#allocation4], 0  ;;  %s1364_s21 = smov [#allocation5]  }
   0x3   :  { %s31_s22 = sshll.u32 %s1364_s21, 4  ;;  %s32_s22 = int_to_ptr.vmem [resolvable:$true] %s31_s22 }
   0x4   :  { %s1286_s23 = scalar_lea.vmem %s32_s22, 512  ;;  %p1291_p1 = scmp.lt.s32.totalorder %s32_s22, %s32_s22 }
   0x5   :  { %p1287_p0 = scmp.ne.s32.totalorder %s32_s22, %s1286_s23  ;;  %p1292_p2 = scmp.lt.s32.totalorder %s1286_s23, %s1286_s23 }
   0x7   :  { %p1293_p3 = por %p1292_p2, %p1291_p1 }
   0x9   :  { %p1294_p4 = pnand %p1293_p3, %p1287_p0 }
   0xb   :  { %1297 = shalt.err (!%p1294_p4)
}
   0xc   :  { %s1365_s24 = smov 128   ;;  %s1366_s25 = smov 8  }
   0xd   :  { %37 = dma.hbm_to_vmem [thread:$0]  %s1622_s2, 512, %s32_s22, [#allocation6], %s1365_s24, %s1365_s24, %s1366_s25  }
   0xe   :  { %s1367_s28 = smov [#allocation2]   ;;  %s1368_s30 = smov [#allocation7]  }
   0xf   :  { %s20_s29 = sshll.u32 %s1367_s28, 4  ;;  %s43_s7 = sshll.u32 %s1368_s30, 4  ;;  %s21_s29 = int_to_ptr.vmem [resolvable:$true] %s20_s29  ;;  %s44_s7 = int_to_ptr.vmem [resolvable:$true] %s43_s7 }
  0x10   :  { %s1306_s8 = scalar_lea.vmem %s21_s29, 128  ;;  %p1311_p6 = scmp.lt.s32.totalorder %s21_s29, %s21_s29 }
  0x11   :  { %p1307_p5 = scmp.ne.s32.totalorder %s21_s29, %s1306_s8  ;;  %p1312_p7 = scmp.lt.s32.totalorder %s1306_s8, %s1306_s8 }
  0x13   :  { %p1313_p8 = por %p1312_p7, %p1311_p6 }
  0x15   :  { %p1314_p9 = pnand %p1313_p8, %p1307_p5 }
  0x17   :  { %1317 = shalt.err (!%p1314_p9)
}
  0x18   :  { %23 = dma.hbm_to_vmem [thread:$0]  %s1620_s0, 128, %s21_s29, [#allocation3]  }
  0x19   :  { %s1326_s11 = scalar_lea.vmem %s44_s7, 512  ;;  %p1331_p11 = scmp.lt.s32.totalorder %s44_s7, %s44_s7 }
  0x1a   :  { %p1327_p10 = scmp.ne.s32.totalorder %s44_s7, %s1326_s11  ;;  %p1332_p12 = scmp.lt.s32.totalorder %s1326_s11, %s1326_s11 }
  0x1c   :  { %p1333_p13 = por %p1332_p12, %p1331_p11 }
  0x1e   :  { %p1334_p0 = pnand %p1333_p13, %p1327_p10 }
  0x20   :  { %1337 = shalt.err (!%p1334_p0)
}
  0x21   :  { %49 = dma.hbm_to_vmem [thread:$0]  %s1623_s3, 512, %s44_s7, [#allocation6], %s1365_s24, %s1365_s24, %s1366_s25  }
  0x22   :  { %1358 = dma.done.wait [#allocation3], 128  }
  0x23   :  { %1359 = vsyncadd [#allocation3], 4294967168 }
  0x24   :  { %1360 = dma.done.wait [#allocation6], 1024  }
  0x25   :  { %1361 = vsyncadd [#allocation6], 4294966272  ;;  %v1369_v0 = vmov 0.0   ;;  %vm1370_vm0 = vmmov 0   ;;  %v67_v1 = vld [vmem:[#allocation5 + $0x18] sm:$0xff]  ;;  %v66_v3 = vld [vmem:[#allocation5 + $0x10] sm:$0xff]  ;;  %v252_v28 = vlaneseq }
  0x26   :  { %1120 = vmatprep.subr.mxu0 %v1369_v0  ;;  %1131 = vmatprep.subr.mxu1 %v1369_v0  ;;  %v1425_v2 = vld [vmem:[#allocation7 + $0x18] sm:$0xff]  ;;  %v1428_v4 = vld [vmem:[#allocation7 + $0x10] sm:$0xff]  ;;  %v65_v5 = vld [vmem:[#allocation5 + $0x8] sm:$0xff]  ;;  %vm75_vm1 = vcmask 261120   ;;  %s1371_s14 = smov 64   ;;  %vm265_vm2 = vcmask 253952  }
  0x27   :  { %1128 = vmatprep.mubr.msk.f32.mxu0 %vm1370_vm0, %v1369_v0  ;;  %1139 = vmatprep.mubr.msk.f32.mxu1 %vm1370_vm0, %v1369_v0  ;;  %v1432_v6 = vld [vmem:[#allocation7 + $0x8] sm:$0xff]  ;;  %v64_v7 = vld [vmem:[#allocation5] sm:$0xff]  ;;  %v63_v9 = vld [vmem:[#allocation2] sm:$0xff]  ;;  %v253_v29 = vshrl.u32 %v252_v28, 7  ;;  %vm373_vm3 = vcmask 254977   ;;  %vm595_vm4 = vcmask 257027  }
  0x28   :  { %1121 = vmatpush3.msra.mxu0 %v67_v1  ;;  %1132 = vmatpush3.msra.mxu1 %v1425_v2  ;;  %v1437_v8 = vld [vmem:[#allocation7] sm:$0xff]  ;;  %v154_v10 = vld [vmem:[%s1621_s1] sm:$0x1]  ;;  %vm817_vm5 = vcmask 259077   ;;  %vm484_vm6 = vcmask 256002   ;;  %vm706_vm7 = vcmask 258052  }
  0x29   :  { %1122 = vmatprep.subr.mxu0 %v1369_v0  ;;  %1133 = vmatprep.subr.mxu1 %v1369_v0  ;;  %v1473_v11 = vld [vmem:[%s1625_s5] sm:$0x1]  ;;  %v254_v30 = vsub.s32 0, %v253_v29  ;;  %s1373_s5 = smov 32   ;;  %vm928_vm8 = vcmask 260102   ;;  %s1374_s17 = smov [#allocation8]  }
  0x2a   :  { %1123 = vmatpush3.msra.mxu0 %v66_v3  ;;  %1134 = vmatpush3.msra.mxu1 %v1428_v4  ;;  %v1057_v17 = vld [vmem:[%s1624_s4] ss:$0 sm:$0xff]  ;;  %s1372_s4 = smov 96   ;;  %s1047_s18 = sshll.u32 %s1374_s17, 4  ;;  %vm1039_vm9 = vcmask 261127   ;;  %s1048_s18 = int_to_ptr.vmem [resolvable:$true] %s1047_s18 }
  0x2b   :  { %1124 = vmatprep.subr.mxu0 %v1369_v0  ;;  %1135 = vmatprep.subr.mxu1 %v1369_v0  ;;  %v255_v32 = vrot.slane %v154_v10, %v254_v30  ;;  %s1338_s19 = scalar_lea.vmem %s1048_s18, 128  ;;  %p1343_p2 = scmp.lt.s32.totalorder %s1048_s18, %s1048_s18 }
  0x2c   :  { %1125 = vmatpush3.msra.mxu0 %v65_v5  ;;  %1136 = vmatpush3.msra.mxu1 %v1432_v6  ;;  %p1339_p1 = scmp.ne.s32.totalorder %s1048_s18, %s1338_s19  ;;  %p1344_p3 = scmp.lt.s32.totalorder %s1338_s19, %s1338_s19 }
  0x2d   :  { %1126 = vmatprep.subr.mxu0 %v1369_v0  ;;  %1137 = vmatprep.subr.mxu1 %v1369_v0 }
  0x2e   :  { %1127 = vmatpush3.msra.mxu0 %v64_v7  ;;  %1138 = vmatpush3.msra.mxu1 %v1437_v8  ;;  %p1345_p4 = por %p1344_p3, %p1343_p2 }
  0x2f   :  { %1129 = vmatmul.mubr.msk.f32.vlgmr.msra.gmra.mxu0 %vm75_vm1, %v63_v9  ;;  %1140 = vmatmul.mubr.msk.f32.vlgmr.msra.gmra.mxu1 %vm75_vm1, %v154_v10 }
  0x30   :  { %1142 = vmatprep.subr.mxu0 %v1369_v0  ;;  %1150 = vmatprep.mubr.msk.f32.mxu0 %vm1370_vm0, %v1369_v0  ;;  %p1346_p5 = pnand %p1345_p4, %p1339_p1 }
  0x31   :  { %1143 = vmatpush3.msra.mxu0 %v1425_v2  ;;  %1153 = vmatprep.subr.mxu1 %v1369_v0 }
  0x32   :  { %1144 = vmatprep.subr.mxu0 %v1369_v0  ;;  %1154 = vmatpush3.msra.mxu1 %v1425_v2 }
  0x33   :  { %1145 = vmatpush3.msra.mxu0 %v1428_v4  ;;  %1155 = vmatprep.subr.mxu1 %v1369_v0 }
  0x34   :  { %1146 = vmatprep.subr.mxu0 %v1369_v0  ;;  %1156 = vmatpush3.msra.mxu1 %v1428_v4 }
  0x35   :  { %1147 = vmatpush3.msra.mxu0 %v1432_v6  ;;  %1157 = vmatprep.subr.mxu1 %v1369_v0 }
  0x36   :  { %1148 = vmatprep.subr.mxu0 %v1369_v0  ;;  %1158 = vmatpush3.msra.mxu1 %v1432_v6 }
  0x37   :  { %1149 = vmatpush3.msra.mxu0 %v1437_v8  ;;  %1159 = vmatprep.subr.mxu1 %v1369_v0 }
  0x38   :  { %1160 = vmatpush3.msra.mxu1 %v1437_v8  ;;  %1161 = vmatprep.mubr.msk.f32.mxu1 %vm1370_vm0, %v1369_v0 }
  0x39   :  { %1164 = vmatprep.subr.mxu0 %v1369_v0  ;;  %1175 = vmatprep.subr.mxu1 %v1369_v0 }
  0xef   :  { %v145_v12 = vpop.f32.mrf.mxu0  ;;  %v224_v13 = vpop.f32.mrf.mxu1 }
  0xf0   :  { %v225_v14 = vadd.f32 %v224_v13, %v1473_v11  ;;  %v1480_v18 = vadd.f32 %v1057_v17, %v145_v12 }
  0xf1   :  { %v1141_v15 = vpop.f32.mrf.mxu1  ;;  %v1130_v16 = vpop.f32.mrf.mxu0 }
  0xf2   :  { %236 = vrot.lane.b32.xlu0 %v225_v14, %s1371_s14  ;;  %v228_v19 = vadd.f32 %v225_v14, %v1480_v18 }
  0xf4   :  { %v1060_v20 = vmul.f32 -1.442695, %v228_v19 }
  0xf6   :  { %1230 = vpow2.f32 %v1060_v20 }
 0x103   :  { %v1231_v21 = vpop.eup %1230 }
 0x104   :  { %v232_v22 = vadd.f32 1.0, %v1231_v21 }
 0x106   :  { %1232 = vrcp.f32 %v232_v22 }
 0x113   :  { %v1233_v23 = vpop.eup %1232 }
 0x114   :  { %v246_v34 = vsub.f32 1.0, %v1233_v23 }
 0x164   :  { %v237_v24 = vpop.permute.xlu0 %236 }
 0x165   :  { %v239_v25 = vmul.f32 %v1233_v23, %v237_v24 }
 0x167   :  { %241 = vrot.lane.b32.xlu0 %v239_v25, %s1371_s14 }
 0x1d9   :  { %v242_v26 = vpop.permute.xlu0 %241 }
 0x1da   :  { %v244_v27 = vadd.f32 %v242_v26, %v1480_v18 }
 0x1dc   :  { %1234 = vtanh.f32 %v244_v27 }
 0x1e9   :  { %v1235_v31 = vpop.eup %1234 }
 0x1ea   :  { %248 = vrot.lane.b32.xlu1 %v1235_v31, %s1372_s4 }
 0x1ee   :  { %256 = vrot.lane.b32.xlu1 %v255_v32, %s1373_s5 }
 0x25c   :  { %v249_v33 = vpop.permute.xlu1 %248 }
 0x25d   :  { %v251_v36 = vmul.f32 %v249_v33, %v246_v34 }
 0x260   :  { %v257_v35 = vpop.permute.xlu1 %256 }
 0x261   :  { %v259_v37 = vmul.f32 %v1233_v23, %v257_v35 }
 0x263   :  { %v260_v38 = vadd.f32 %v259_v37, %v251_v36 }
 0x265   :  { %262 = vrot.lane.b32.xlu0 %v260_v38, %s1372_s4  ;;  %v365_v54 = vrot.slane %v260_v38, 7 }
 0x2d7   :  { %v263_v39 = vpop.permute.xlu0 %262 }
 0x2d8   :  { %266 = vst.msk [vmem:[#allocation8] sm:$0x1] %vm265_vm2, %v263_v39  ;;  %1151 = vmatmul.mubr.msk.f32.vlgmr.msra.gmra.mxu0 %vm75_vm1, %v263_v39 }
 0x2d9   :  { %1165 = vmatpush3.msra.mxu0 %v1425_v2  ;;  %1172 = vmatprep.mubr.msk.f32.mxu0 %vm1370_vm0, %v1369_v0 }
 0x2da   :  { %1166 = vmatprep.subr.mxu0 %v1369_v0 }
 0x2db   :  { %1167 = vmatpush3.msra.mxu0 %v1428_v4 }
 0x2dc   :  { %1168 = vmatprep.subr.mxu0 %v1369_v0 }
 0x2dd   :  { %1169 = vmatpush3.msra.mxu0 %v1432_v6 }
 0x2de   :  { %1170 = vmatprep.subr.mxu0 %v1369_v0 }
 0x2df   :  { %1171 = vmatpush3.msra.mxu0 %v1437_v8 }
 0x2e0   :  { %1186 = vmatprep.subr.mxu0 %v1369_v0 }
 0x398   :  { %v335_v40 = vpop.f32.mrf.mxu0 }
 0x399   :  { %v336_v41 = vadd.f32 %v335_v40, %v1473_v11 }
 0x39a   :  { %v1152_v42 = vpop.f32.mrf.mxu0 }
 0x39b   :  { %v340_v43 = vrot.slane %v336_v41, 7 }
 0x39d   :  { %349 = vrot.lane.b32.xlu1 %v340_v43, %s1371_s14  ;;  %v342_v44 = vadd.f32 %v340_v43, %v1480_v18 }
 0x39f   :  { %v1062_v45 = vmul.f32 -1.442695, %v342_v44 }
 0x3a1   :  { %1236 = vpow2.f32 %v1062_v45 }
 0x3ae   :  { %v1237_v46 = vpop.eup %1236 }
 0x3af   :  { %v346_v47 = vadd.f32 1.0, %v1237_v46 }
 0x3b1   :  { %1238 = vrcp.f32 %v346_v47 }
 0x3be   :  { %v1239_v48 = vpop.eup %1238 }
 0x3bf   :  { %v359_v55 = vsub.f32 1.0, %v1239_v48  ;;  %v367_v57 = vmul.f32 %v1239_v48, %v365_v54 }
 0x40f   :  { %v350_v49 = vpop.permute.xlu1 %349 }
 0x410   :  { %v352_v50 = vmul.f32 %v1239_v48, %v350_v49 }
 0x412   :  { %354 = vrot.lane.b32.xlu0 %v352_v50, %s1371_s14 }
 0x484   :  { %v355_v51 = vpop.permute.xlu0 %354 }
 0x485   :  { %v357_v52 = vadd.f32 %v355_v51, %v1480_v18 }
 0x487   :  { %1240 = vtanh.f32 %v357_v52 }
 0x494   :  { %v1241_v53 = vpop.eup %1240 }
 0x495   :  { %361 = vrot.lane.b32.xlu1 %v1241_v53, %s1372_s4 }
 0x507   :  { %v362_v56 = vpop.permute.xlu1 %361 }
 0x508   :  { %v364_v58 = vmul.f32 %v362_v56, %v359_v55 }
 0x50a   :  { %v1504_v59 = vadd.f32 %v367_v57, %v364_v58 }
 0x50c   :  { %v375_v60 = vrot.slane %v1504_v59, 1  ;;  %v476_v20 = vrot.slane %v1504_v59, 7 }
 0x50e   :  { %376 = vrot.lane.b32.xlu0 %v375_v60, %s1372_s4 }
 0x580   :  { %v377_v61 = vpop.permute.xlu0 %376 }
 0x581   :  { %1162 = vmatmul.mubr.msk.f32.vlgmr.msra.gmra.mxu1 %vm75_vm1, %v377_v61 }
 0x582   :  { %1176 = vmatpush3.msra.mxu1 %v1425_v2  ;;  %1183 = vmatprep.mubr.msk.f32.mxu1 %vm1370_vm0, %v1369_v0 }
 0x583   :  { %1177 = vmatprep.subr.mxu1 %v1369_v0 }
 0x584   :  { %1178 = vmatpush3.msra.mxu1 %v1428_v4 }
 0x585   :  { %1179 = vmatprep.subr.mxu1 %v1369_v0 }
 0x586   :  { %1180 = vmatpush3.msra.mxu1 %v1432_v6 }
 0x587   :  { %1181 = vmatprep.subr.mxu1 %v1369_v0 }
 0x588   :  { %1182 = vmatpush3.msra.mxu1 %v1437_v8 }
 0x589   :  { %1197 = vmatprep.subr.mxu1 %v1369_v0 }
 0x641   :  { %v446_v62 = vpop.f32.mrf.mxu1 }
 0x642   :  { %v447_v63 = vadd.f32 %v446_v62, %v1473_v11 }
 0x643   :  { %v1163_v1 = vpop.f32.mrf.mxu1 }
 0x644   :  { %v451_v3 = vrot.slane %v447_v63, 6 }
 0x646   :  { %460 = vrot.lane.b32.xlu1 %v451_v3, %s1371_s14  ;;  %v453_v5 = vadd.f32 %v451_v3, %v1480_v18 }
 0x648   :  { %v1064_v7 = vmul.f32 -1.442695, %v453_v5 }
 0x64a   :  { %1242 = vpow2.f32 %v1064_v7 }
 0x657   :  { %v1243_v9 = vpop.eup %1242 }
 0x658   :  { %v457_v10 = vadd.f32 1.0, %v1243_v9 }
 0x65a   :  { %1244 = vrcp.f32 %v457_v10 }
 0x667   :  { %v1245_v12 = vpop.eup %1244 }
 0x668   :  { %v470_v19 = vsub.f32 1.0, %v1245_v12  ;;  %v478_v22 = vmul.f32 %v1245_v12, %v476_v20 }
 0x6b8   :  { %v461_v13 = vpop.permute.xlu1 %460 }
 0x6b9   :  { %v463_v14 = vmul.f32 %v1245_v12, %v461_v13 }
 0x6bb   :  { %465 = vrot.lane.b32.xlu0 %v463_v14, %s1371_s14 }
 0x72d   :  { %v466_v15 = vpop.permute.xlu0 %465 }
 0x72e   :  { %v468_v16 = vadd.f32 %v466_v15, %v1480_v18 }
 0x730   :  { %1246 = vtanh.f32 %v468_v16 }
 0x73d   :  { %v1247_v17 = vpop.eup %1246 }
 0x73e   :  { %472 = vrot.lane.b32.xlu1 %v1247_v17, %s1372_s4 }
 0x7b0   :  { %v473_v21 = vpop.permute.xlu1 %472 }
 0x7b1   :  { %v475_v23 = vmul.f32 %v473_v21, %v470_v19 }
 0x7b3   :  { %v1526_v24 = vadd.f32 %v478_v22, %v475_v23 }
 0x7b5   :  { %v486_v25 = vrot.slane %v1526_v24, 2  ;;  %v587_v42 = vrot.slane %v1526_v24, 7 }
 0x7b7   :  { %487 = vrot.lane.b32.xlu0 %v486_v25, %s1372_s4 }
 0x829   :  { %v488_v26 = vpop.permute.xlu0 %487 }
 0x82a   :  { %1173 = vmatmul.mubr.msk.f32.vlgmr.msra.gmra.mxu0 %vm75_vm1, %v488_v26 }
 0x82b   :  { %1187 = vmatpush3.msra.mxu0 %v1425_v2  ;;  %1194 = vmatprep.mubr.msk.f32.mxu0 %vm1370_vm0, %v1369_v0 }
 0x82c   :  { %1188 = vmatprep.subr.mxu0 %v1369_v0 }
 0x82d   :  { %1189 = vmatpush3.msra.mxu0 %v1428_v4 }
 0x82e   :  { %1190 = vmatprep.subr.mxu0 %v1369_v0 }
 0x82f   :  { %1191 = vmatpush3.msra.mxu0 %v1432_v6 }
 0x830   :  { %1192 = vmatprep.subr.mxu0 %v1369_v0 }
 0x831   :  { %1193 = vmatpush3.msra.mxu0 %v1437_v8 }
 0x832   :  { %1208 = vmatprep.subr.mxu0 %v1369_v0 }
 0x8ea   :  { %v557_v27 = vpop.f32.mrf.mxu0 }
 0x8eb   :  { %v558_v28 = vadd.f32 %v557_v27, %v1473_v11 }
 0x8ec   :  { %v1174_v29 = vpop.f32.mrf.mxu0 }
 0x8ed   :  { %v562_v30 = vrot.slane %v558_v28, 5 }
 0x8ef   :  { %571 = vrot.lane.b32.xlu1 %v562_v30, %s1371_s14  ;;  %v564_v31 = vadd.f32 %v562_v30, %v1480_v18 }
 0x8f1   :  { %v1066_v32 = vmul.f32 -1.442695, %v564_v31 }
 0x8f3   :  { %1248 = vpow2.f32 %v1066_v32 }
 0x900   :  { %v1249_v33 = vpop.eup %1248 }
 0x901   :  { %v568_v34 = vadd.f32 1.0, %v1249_v33 }
 0x903   :  { %1250 = vrcp.f32 %v568_v34 }
 0x910   :  { %v1251_v35 = vpop.eup %1250 }
 0x911   :  { %v581_v41 = vsub.f32 1.0, %v1251_v35  ;;  %v589_v44 = vmul.f32 %v1251_v35, %v587_v42 }
 0x961   :  { %v572_v36 = vpop.permute.xlu1 %571 }
 0x962   :  { %v574_v37 = vmul.f32 %v1251_v35, %v572_v36 }
 0x964   :  { %576 = vrot.lane.b32.xlu0 %v574_v37, %s1371_s14 }
 0x9d6   :  { %v577_v38 = vpop.permute.xlu0 %576 }
 0x9d7   :  { %v579_v39 = vadd.f32 %v577_v38, %v1480_v18 }
 0x9d9   :  { %1252 = vtanh.f32 %v579_v39 }
 0x9e6   :  { %v1253_v40 = vpop.eup %1252 }
 0x9e7   :  { %583 = vrot.lane.b32.xlu1 %v1253_v40, %s1372_s4 }
 0xa59   :  { %v584_v43 = vpop.permute.xlu1 %583 }
 0xa5a   :  { %v586_v45 = vmul.f32 %v584_v43, %v581_v41 }
 0xa5c   :  { %v1548_v46 = vadd.f32 %v589_v44, %v586_v45 }
 0xa5e   :  { %v597_v47 = vrot.slane %v1548_v46, 3  ;;  %v698_v3 = vrot.slane %v1548_v46, 7 }
 0xa60   :  { %598 = vrot.lane.b32.xlu0 %v597_v47, %s1372_s4 }
 0xad2   :  { %v599_v48 = vpop.permute.xlu0 %598 }
 0xad3   :  { %1184 = vmatmul.mubr.msk.f32.vlgmr.msra.gmra.mxu1 %vm75_vm1, %v599_v48 }
 0xad4   :  { %1198 = vmatpush3.msra.mxu1 %v1425_v2  ;;  %1205 = vmatprep.mubr.msk.f32.mxu1 %vm1370_vm0, %v1369_v0 }
 0xad5   :  { %1199 = vmatprep.subr.mxu1 %v1369_v0 }
 0xad6   :  { %1200 = vmatpush3.msra.mxu1 %v1428_v4 }
 0xad7   :  { %1201 = vmatprep.subr.mxu1 %v1369_v0 }
 0xad8   :  { %1202 = vmatpush3.msra.mxu1 %v1432_v6 }
 0xad9   :  { %1203 = vmatprep.subr.mxu1 %v1369_v0 }
 0xada   :  { %1204 = vmatpush3.msra.mxu1 %v1437_v8 }
 0xb93   :  { %v668_v49 = vpop.f32.mrf.mxu1 }
 0xb94   :  { %v669_v50 = vadd.f32 %v668_v49, %v1473_v11 }
 0xb95   :  { %v1185_v51 = vpop.f32.mrf.mxu1 }
 0xb96   :  { %v673_v52 = vrot.slane %v669_v50, 4 }
 0xb98   :  { %682 = vrot.lane.b32.xlu1 %v673_v52, %s1371_s14  ;;  %v675_v53 = vadd.f32 %v673_v52, %v1480_v18 }
 0xb9a   :  { %v1068_v54 = vmul.f32 -1.442695, %v675_v53 }
 0xb9c   :  { %1254 = vpow2.f32 %v1068_v54 }
 0xba9   :  { %v1255_v55 = vpop.eup %1254 }
 0xbaa   :  { %v679_v56 = vadd.f32 1.0, %v1255_v55 }
 0xbac   :  { %1256 = vrcp.f32 %v679_v56 }
 0xbb9   :  { %v1257_v57 = vpop.eup %1256 }
 0xbba   :  { %v692_v1 = vsub.f32 1.0, %v1257_v57  ;;  %v700_v7 = vmul.f32 %v1257_v57, %v698_v3 }
 0xc0a   :  { %v683_v58 = vpop.permute.xlu1 %682 }
 0xc0b   :  { %v685_v60 = vmul.f32 %v1257_v57, %v683_v58 }
 0xc0d   :  { %687 = vrot.lane.b32.xlu0 %v685_v60, %s1371_s14 }
 0xc7f   :  { %v688_v61 = vpop.permute.xlu0 %687 }
 0xc80   :  { %v690_v62 = vadd.f32 %v688_v61, %v1480_v18 }
 0xc82   :  { %1258 = vtanh.f32 %v690_v62 }
 0xc8f   :  { %v1259_v63 = vpop.eup %1258 }
 0xc90   :  { %694 = vrot.lane.b32.xlu1 %v1259_v63, %s1372_s4 }
 0xd02   :  { %v695_v5 = vpop.permute.xlu1 %694 }
 0xd03   :  { %v697_v9 = vmul.f32 %v695_v5, %v692_v1 }
 0xd05   :  { %v1569_v10 = vadd.f32 %v700_v7, %v697_v9 }
 0xd07   :  { %v708_v12 = vrot.slane %v1569_v10, 4  ;;  %v809_v26 = vrot.slane %v1569_v10, 7 }
 0xd09   :  { %709 = vrot.lane.b32.xlu0 %v708_v12, %s1372_s4 }
 0xd7b   :  { %v710_v13 = vpop.permute.xlu0 %709 }
 0xd7c   :  { %1195 = vmatmul.mubr.msk.f32.vlgmr.msra.gmra.mxu0 %vm75_vm1, %v710_v13 }
 0xd7d   :  { %1209 = vmatpush3.msra.mxu0 %v1425_v2  ;;  %1216 = vmatprep.mubr.msk.f32.mxu0 %vm1370_vm0, %v1369_v0 }
 0xd7e   :  { %1210 = vmatprep.subr.mxu0 %v1369_v0 }
 0xd7f   :  { %1211 = vmatpush3.msra.mxu0 %v1428_v4 }
 0xd80   :  { %1212 = vmatprep.subr.mxu0 %v1369_v0 }
 0xd81   :  { %1213 = vmatpush3.msra.mxu0 %v1432_v6 }
 0xd82   :  { %1214 = vmatprep.subr.mxu0 %v1369_v0 }
 0xd83   :  { %1215 = vmatpush3.msra.mxu0 %v1437_v8 }
 0xe3c   :  { %v779_v14 = vpop.f32.mrf.mxu0 }
 0xe3d   :  { %v780_v15 = vadd.f32 %v779_v14, %v1473_v11 }
 0xe3e   :  { %v1196_v16 = vpop.f32.mrf.mxu0 }
 0xe3f   :  { %v784_v2 = vrot.slane %v780_v15, 3 }
 0xe41   :  { %793 = vrot.lane.b32.xlu1 %v784_v2, %s1371_s14  ;;  %v786_v17 = vadd.f32 %v784_v2, %v1480_v18 }
 0xe43   :  { %v1070_v19 = vmul.f32 -1.442695, %v786_v17 }
 0xe45   :  { %1260 = vpow2.f32 %v1070_v19 }
 0xe52   :  { %v1261_v4 = vpop.eup %1260 }
 0xe53   :  { %v790_v20 = vadd.f32 1.0, %v1261_v4 }
 0xe55   :  { %1262 = vrcp.f32 %v790_v20 }
 0xe62   :  { %v1263_v21 = vpop.eup %1262 }
 0xe63   :  { %v803_v25 = vsub.f32 1.0, %v1263_v21  ;;  %v811_v28 = vmul.f32 %v1263_v21, %v809_v26 }
 0xeb3   :  { %v794_v6 = vpop.permute.xlu1 %793 }
 0xeb4   :  { %v796_v22 = vmul.f32 %v1263_v21, %v794_v6 }
 0xeb6   :  { %798 = vrot.lane.b32.xlu0 %v796_v22, %s1371_s14 }
 0xf28   :  { %v799_v0 = vpop.permute.xlu0 %798 }
 0xf29   :  { %v801_v8 = vadd.f32 %v799_v0, %v1480_v18 }
 0xf2b   :  { %1264 = vtanh.f32 %v801_v8 }
 0xf38   :  { %v1265_v23 = vpop.eup %1264 }
 0xf39   :  { %805 = vrot.lane.b32.xlu1 %v1265_v23, %s1372_s4 }
 0xfab   :  { %v806_v27 = vpop.permute.xlu1 %805 }
 0xfac   :  { %v808_v29 = vmul.f32 %v806_v27, %v803_v25 }
 0xfae   :  { %v812_v30 = vadd.f32 %v811_v28, %v808_v29 }
 0xfb0   :  { %v819_v31 = vrot.slane %v812_v30, 5  ;;  %v920_v49 = vrot.slane %v812_v30, 7 }
 0xfb2   :  { %820 = vrot.lane.b32.xlu0 %v819_v31, %s1372_s4 }
0x1024   :  { %v821_v32 = vpop.permute.xlu0 %820 }
0x1025   :  { %1206 = vmatmul.mubr.msk.f32.vlgmr.msra.gmra.mxu1 %vm75_vm1, %v821_v32 }
0x10e5   :  { %v890_v33 = vpop.f32.mrf.mxu1 }
0x10e6   :  { %v891_v34 = vadd.f32 %v890_v33, %v1473_v11 }
0x10e7   :  { %v1207_v35 = vpop.f32.mrf.mxu1 }
0x10e8   :  { %v895_v36 = vrot.slane %v891_v34, 2 }
0x10ea   :  { %904 = vrot.lane.b32.xlu1 %v895_v36, %s1371_s14  ;;  %v897_v37 = vadd.f32 %v895_v36, %v1480_v18 }
0x10ec   :  { %v1072_v38 = vmul.f32 -1.442695, %v897_v37 }
0x10ee   :  { %1266 = vpow2.f32 %v1072_v38 }
0x10fb   :  { %v1267_v39 = vpop.eup %1266 }
0x10fc   :  { %v901_v40 = vadd.f32 1.0, %v1267_v39 }
0x10fe   :  { %1268 = vrcp.f32 %v901_v40 }
0x110b   :  { %v1269_v41 = vpop.eup %1268 }
0x110c   :  { %v914_v48 = vsub.f32 1.0, %v1269_v41  ;;  %v922_v51 = vmul.f32 %v1269_v41, %v920_v49 }
0x115c   :  { %v905_v42 = vpop.permute.xlu1 %904 }
0x115d   :  { %v907_v43 = vmul.f32 %v1269_v41, %v905_v42 }
0x115f   :  { %909 = vrot.lane.b32.xlu0 %v907_v43, %s1371_s14 }
0x11d1   :  { %v910_v44 = vpop.permute.xlu0 %909 }
0x11d2   :  { %v912_v45 = vadd.f32 %v910_v44, %v1480_v18 }
0x11d4   :  { %1270 = vtanh.f32 %v912_v45 }
0x11e1   :  { %v1271_v47 = vpop.eup %1270 }
0x11e2   :  { %916 = vrot.lane.b32.xlu1 %v1271_v47, %s1372_s4 }
0x1254   :  { %v917_v50 = vpop.permute.xlu1 %916 }
0x1255   :  { %v919_v52 = vmul.f32 %v917_v50, %v914_v48 }
0x1257   :  { %v923_v53 = vadd.f32 %v922_v51, %v919_v52 }
0x1259   :  { %v930_v54 = vrot.slane %v923_v53, 6 }
0x125b   :  { %931 = vrot.lane.b32.xlu0 %v930_v54, %s1372_s4 }
0x12cd   :  { %v932_v55 = vpop.permute.xlu0 %931 }
0x12ce   :  { %1217 = vmatmul.mubr.msk.f32.vlgmr.msra.gmra.mxu0 %vm75_vm1, %v932_v55 }
0x138e   :  { %v1001_v56 = vpop.f32.mrf.mxu0 }
0x138f   :  { %v1002_v57 = vadd.f32 %v1001_v56, %v1473_v11 }
0x1390   :  { %v1218_v58 = vpop.f32.mrf.mxu0 }
0x1391   :  { %v1006_v60 = vrot.slane %v1002_v57, 1 }
0x1393   :  { %1015 = vrot.lane.b32.xlu1 %v1006_v60, %s1371_s14  ;;  %v1008_v61 = vadd.f32 %v1006_v60, %v1480_v18 }
0x1395   :  { %v1074_v62 = vmul.f32 -1.442695, %v1008_v61 }
0x1397   :  { %1272 = vpow2.f32 %v1074_v62 }
0x13a4   :  { %v1273_v63 = vpop.eup %1272 }
0x13a5   :  { %v1012_v1 = vadd.f32 1.0, %v1273_v63 }
0x13a7   :  { %1274 = vrcp.f32 %v1012_v1 }
0x13b4   :  { %v1275_v3 = vpop.eup %1274 }
0x1405   :  { %v1016_v5 = vpop.permute.xlu1 %1015 }
0x1406   :  { %v1018_v7 = vmul.f32 %v1275_v3, %v1016_v5 }
0x1408   :  { %1020 = vrot.lane.b32.xlu0 %v1018_v7, %s1371_s14 }
0x140c   :  { %370 = vrot.lane.b32.xlu0 %v1504_v59, %s1372_s4  ;;  %v1031_v59 = vrot.slane %v923_v53, 7 }
0x140e   :  { %v1033_v16 = vmul.f32 %v1275_v3, %v1031_v59 }
0x1410   :  { %592 = vrot.lane.b32.xlu0 %v1548_v46, %s1372_s4 }
0x1414   :  { %814 = vrot.lane.b32.xlu0 %v812_v30, %s1372_s4 }
0x147a   :  { %v1021_v11 = vpop.permute.xlu0 %1020 }
0x147b   :  { %v1023_v9 = vadd.f32 %v1021_v11, %v1480_v18  ;;  %v1025_v18 = vsub.f32 1.0, %v1275_v3 }
0x147d   :  { %1276 = vtanh.f32 %v1023_v9 }
0x147e   :  { %v371_v12 = vpop.permute.xlu0 %370 }
0x147f   :  { %374 = vst.msk [vmem:[#allocation8] sm:$0x2] %vm373_vm3, %v371_v12 }
0x1482   :  { %v593_v13 = vpop.permute.xlu0 %592 }
0x1483   :  { %596 = vst.msk [vmem:[#allocation8] sm:$0x8] %vm595_vm4, %v593_v13 }
0x1486   :  { %v815_v14 = vpop.permute.xlu0 %814 }
0x1487   :  { %818 = vst.msk [vmem:[#allocation8] sm:$0x20] %vm817_vm5, %v815_v14 }
0x148a   :  { %v1277_v15 = vpop.eup %1276 }
0x148b   :  { %1027 = vrot.lane.b32.xlu1 %v1277_v15, %s1372_s4 }
0x148f   :  { %481 = vrot.lane.b32.xlu1 %v1526_v24, %s1372_s4 }
0x1493   :  { %703 = vrot.lane.b32.xlu1 %v1569_v10, %s1372_s4 }
0x1497   :  { %925 = vrot.lane.b32.xlu1 %v923_v53, %s1372_s4 }
0x14fd   :  { %v1028_v46 = vpop.permute.xlu1 %1027 }
0x14fe   :  { %v1030_v2 = vmul.f32 %v1028_v46, %v1025_v18 }
0x1500   :  { %v1034_v17 = vadd.f32 %v1033_v16, %v1030_v2 }
0x1501   :  { %v482_v19 = vpop.permute.xlu1 %481 }
0x1502   :  { %485 = vst.msk [vmem:[#allocation8] sm:$0x4] %vm484_vm6, %v482_v19  ;;  %1036 = vrot.lane.b32.xlu0 %v1034_v17, %s1372_s4 }
0x1505   :  { %v704_v4 = vpop.permute.xlu1 %703 }
0x1506   :  { %707 = vst.msk [vmem:[#allocation8] sm:$0x10] %vm706_vm7, %v704_v4 }
0x1509   :  { %v926_v24 = vpop.permute.xlu1 %925 }
0x150a   :  { %929 = vst.msk [vmem:[#allocation8] sm:$0x40] %vm928_vm8, %v926_v24 }
0x1574   :  { %v1037_v10 = vpop.permute.xlu0 %1036 }
0x1575   :  { %1040 = vst.msk [vmem:[#allocation8] sm:$0x80] %vm1039_vm9, %v1037_v10 }
0x1576   :  { %1349 = shalt.err (!%p1346_p5)
}
0x1577   :  { %1050 = dma.vmem_to_hbm [thread:$0]  %s1048_s18, 128, %s1626_s6, [#allocation4]  }
0x1578   :  { %1362 = dma.done.wait [#allocation4], 128  }
0x1579   :  { %1363 = vsyncadd [#allocation4], 4294967168 }
0x157a   :  { %1054 = vsyncpa [#allocation3], 1 }
0x157b   :  { %1055 = vsyncpa [#allocation6], 1 }
0x157c   :  { %1056 = vsyncpa [#allocation4], 1 }

</bundles_post_ra>
